<compile_context>
chip_gen: v7x
topology: tpu7x:2x2x1
jax: 0.10.0
libtpu: 0.0.40
codegen_flags: <defaults>
</compile_context>

<pallas_src>
import jax
import jax.numpy as jnp
from jax.experimental import pallas as pl
from jax.experimental.pallas import tpu as pltpu

_LANE = 128            # vreg lane width
_SUBLANE = 8           # vreg sublane count
_MAX_TILE_ROWS = 2048  # 2048 x 128 x 4B = 1 MiB per input tile (x2 inputs x2 buffers = 4 MiB)
_PAD_LOGIT = -1e30     # BCE-with-logits is exactly 0 at (x = -1e30, t = 0)


def _round_up(x, m):
    return ((x + m - 1) // m) * m


def _wml_kernel(x_ref, t_ref, w_ref, out_ref):
    """Accumulate per-lane weighted-BCE sums for one (tile_rows, width) tile."""
    # Zero this partial's accumulator at the start of its reduction sweep.
    @pl.when(pl.program_id(1) == 0)
    def _():
        out_ref[...] = jnp.zeros_like(out_ref)

    x = x_ref[...].astype(jnp.float32)      # (tile_rows, width) logits
    t = t_ref[...].astype(jnp.float32)      # (tile_rows, width) targets
    w = w_ref[...].astype(jnp.float32)      # (1, width) per-lane (per-class) weights

    # Numerically-stable BCE-with-logits (identical to torch's formulation).
    loss = jnp.maximum(x, 0.0) - x * t + jnp.log1p(jnp.exp(-jnp.abs(x)))

    # Reduce over rows first (XLU), then one weight multiply per lane (VPU).
    col_sum = jnp.sum(loss, axis=0, keepdims=True)          # (1, width)
    out_ref[...] += (col_sum * w)[None, :, :]                # (1, 1, width) accumulator


def weighted_multilabel_loss(outputs, targets, weights, *, max_tile_rows=_MAX_TILE_ROWS):
    """outputs, targets: (N, C) (f32 or bf16); weights: (C,). Returns scalar f32 loss."""
    n, c = outputs.shape
    total = n * c

    # ---- Build a lane-dense 2-D view (rows, width) with a per-lane weight row. ----
    if _LANE % c == 0:
        # Small C: flatten so every lane is live; lane l holds class (l % C).
        width = _LANE
        w_row = jnp.tile(weights.astype(jnp.float32), _LANE // c).reshape(1, width)
        x_flat = outputs.reshape(-1)
        t_flat = targets.reshape(-1)
        rows_needed = -(-total // width)
    else:
        # Keep classes on lanes; pad C up to a multiple of 128 with zero-weight columns.
        width = _round_up(c, _LANE)
        pad_c = width - c
        x2 = jnp.pad(outputs, ((0, 0), (0, pad_c)), constant_values=_PAD_LOGIT)
        t2 = jnp.pad(targets, ((0, 0), (0, pad_c)), constant_values=0)
        w_row = jnp.pad(weights.astype(jnp.float32), (0, pad_c)).reshape(1, width)
        x_flat = x2.reshape(-1)
        t_flat = t2.reshape(-1)
        rows_needed = n

    # ---- Tile / grid geometry. ----
    tile_rows = _round_up(min(max_tile_rows, rows_needed), _SUBLANE)
    tiles = -(-rows_needed // tile_rows)
    num_partials = 2 if tiles >= 2 else 1          # shard the row loop across TCs (v7x megacore)
    tiles = _round_up(tiles, num_partials)
    tiles_per_partial = tiles // num_partials
    rows_padded = tiles * tile_rows

    # Row padding: padded elements contribute exactly 0 loss (x = -1e30, t = 0).
    pad = rows_padded * width - x_flat.shape[0]
    if pad:
        x_flat = jnp.pad(x_flat, (0, pad), constant_values=_PAD_LOGIT)
        t_flat = jnp.pad(t_flat, (0, pad), constant_values=0)
    x2d = x_flat.reshape(rows_padded, width)
    t2d = t_flat.reshape(rows_padded, width)

    row_map = lambda p, i: (p * tiles_per_partial + i, 0)

    partials = pl.pallas_call(
        _wml_kernel,
        out_shape=jax.ShapeDtypeStruct((num_partials, 1, width), jnp.float32),
        grid_spec=pltpu.PrefetchScalarGridSpec(
            num_scalar_prefetch=0,
            grid=(num_partials, tiles_per_partial),
            in_specs=[
                pl.BlockSpec((tile_rows, width), row_map),
                pl.BlockSpec((tile_rows, width), row_map),
                pl.BlockSpec((1, width), lambda p, i: (0, 0)),
            ],
            out_specs=pl.BlockSpec((1, 1, width), lambda p, i: (p, 0, 0)),
        ),
        compiler_params=pltpu.CompilerParams(
            dimension_semantics=("parallel", "arbitrary"),
            vmem_limit_bytes=32 * 1024 * 1024,
        ),
    )(x2d, t2d, w_row)

    # Tiny finalize: sum per-core/per-lane partials and divide by the TRUE element count.
    return jnp.sum(partials) / jnp.float32(total)


def _reference(outputs, targets, weights):
    x = outputs.astype(jnp.float32)
    t = targets.astype(jnp.float32)
    loss = jnp.maximum(x, 0.0) - x * t + jnp.log1p(jnp.exp(-jnp.abs(x)))
    return jnp.mean(loss * weights.astype(jnp.float32)[None, :])


if __name__ == "__main__":
    # --- main case: small multilabel head, lane-dense repack path (C divides 128) ---
    k1, k2, k3 = jax.random.split(jax.random.PRNGKey(0), 3)
    N, C = 8, 16
    outputs = jax.random.normal(k1, (N, C), dtype=jnp.float32)            # logits
    targets = (jax.random.uniform(k2, (N, C)) > 0.5).astype(jnp.float32)  # {0,1} labels
    weights = jax.random.uniform(k3, (C,), dtype=jnp.float32) + 0.5       # per-class weights

    loss = weighted_multilabel_loss(outputs, targets, weights)
    jax.block_until_ready(loss)
    ref = _reference(outputs, targets, weights)
    assert jnp.allclose(loss, ref, rtol=1e-5, atol=1e-6), (loss, ref)

    # --- odd C: pad-to-128-columns path, ragged last row tile ---
    k4, k5, k6 = jax.random.split(jax.random.PRNGKey(1), 3)
    N2, C2 = 10, 5
    o2 = jax.random.normal(k4, (N2, C2), dtype=jnp.float32)
    t2 = (jax.random.uniform(k5, (N2, C2)) > 0.5).astype(jnp.float32)
    w2 = jax.random.uniform(k6, (C2,), dtype=jnp.float32) + 0.5
    loss2 = weighted_multilabel_loss(o2, t2, w2)
    jax.block_until_ready(loss2)
    assert jnp.allclose(loss2, _reference(o2, t2, w2), rtol=1e-5, atol=1e-6), loss2

    # --- multi-tile / two-partial accumulation path with narrow (bf16) inputs ---
    k7, k8, k9 = jax.random.split(jax.random.PRNGKey(2), 3)
    N3, C3 = 256, 16
    o3 = jax.random.normal(k7, (N3, C3), dtype=jnp.bfloat16)
    t3 = (jax.random.uniform(k8, (N3, C3)) > 0.5).astype(jnp.bfloat16)
    w3 = jax.random.uniform(k9, (C3,), dtype=jnp.float32) + 0.5
    loss3 = weighted_multilabel_loss(o3, t3, w3, max_tile_rows=8)  # small tiles -> exercises grid
    jax.block_until_ready(loss3)
    assert jnp.allclose(loss3, _reference(o3, t3, w3), rtol=1e-4, atol=1e-5), loss3

    print("KERNEL_OK")
</pallas_src>

<mosaic_0001>
module attributes {stable_mosaic.version = 11 : i64} {
  func.func @_wml_kernel(%arg0: i32, %arg1: i32, %arg2: memref<8x128xf32, #tpu.memory_space<vmem>>, %arg3: memref<8x128xf32, #tpu.memory_space<vmem>>, %arg4: memref<1x128xf32, #tpu.memory_space<vmem>>, %arg5: memref<1x1x128xf32, #tpu.memory_space<vmem>>) attributes {dimension_semantics = [#tpu.dimension_semantics<parallel>, #tpu.dimension_semantics<arbitrary>], iteration_bounds = array<i64: 1, 1>, scalar_prefetch = 0 : i64, scratch_operands = 0 : i64, tpu.core_type = #tpu.core_type<tc>, window_params = [{transform_indices = @transform_0, window_bounds = array<i64: 8, 128>}, {transform_indices = @transform_1, window_bounds = array<i64: 8, 128>}, {pipeline_mode = #tpu.pipeline_mode<synchronous>, transform_indices = @transform_2, window_bounds = array<i64: 1, 128>}, {transform_indices = @transform_3, window_bounds = array<i64: 1, 1, 128>}]} {
    %c0_i32 = arith.constant 0 : i32
    %0 = arith.cmpi eq, %arg1, %c0_i32 : i32
    %1 = arith.extui %0 : i1 to i32
    %c0_i32_0 = arith.constant 0 : i32
    %2 = arith.cmpi ne, %1, %c0_i32_0 : i32
    scf.if %2 {
      %cst_14 = arith.constant 0.000000e+00 : f32
      %23 = vector.broadcast %cst_14 : f32 to vector<1x1x128xf32>
      %c0_15 = arith.constant 0 : index
      %c0_16 = arith.constant 0 : index
      %c0_17 = arith.constant 0 : index
      %24 = vector.load %arg5[%c0_15, %c0_16, %c0_17] : memref<1x1x128xf32, #tpu.memory_space<vmem>>, vector<1x1x128xf32>
      tpu.vector_store %arg5[%c0_15, %c0_16, %c0_17], %23 {strides = array<i32>} : memref<1x1x128xf32, #tpu.memory_space<vmem>>, vector<1x1x128xf32>,
    } else {
    }
    %c0 = arith.constant 0 : index
    %c0_1 = arith.constant 0 : index
    %3 = vector.load %arg2[%c0, %c0_1] : memref<8x128xf32, #tpu.memory_space<vmem>>, vector<8x128xf32>
    %c0_2 = arith.constant 0 : index
    %c0_3 = arith.constant 0 : index
    %4 = vector.load %arg3[%c0_2, %c0_3] : memref<8x128xf32, #tpu.memory_space<vmem>>, vector<8x128xf32>
    %c0_4 = arith.constant 0 : index
    %c0_5 = arith.constant 0 : index
    %5 = vector.load %arg4[%c0_4, %c0_5] : memref<1x128xf32, #tpu.memory_space<vmem>>, vector<1x128xf32>
    %cst = arith.constant 0.000000e+00 : f32
    %6 = vector.broadcast %cst : f32 to vector<8x128xf32>
    %7 = arith.maximumf %3, %6 : vector<8x128xf32>
    %8 = arith.mulf %3, %4 : vector<8x128xf32>
    %9 = arith.subf %7, %8 : vector<8x128xf32>
    %10 = math.absf %3 : vector<8x128xf32>
    %cst_6 = arith.constant 0.000000e+00 : f32
    %11 = vector.broadcast %cst_6 : f32 to vector<8x128xf32>
    %12 = arith.subf %11, %10 : vector<8x128xf32>
    %13 = math.exp %12 : vector<8x128xf32>
    %14 = math.log1p %13 : vector<8x128xf32>
    %15 = arith.addf %9, %14 : vector<8x128xf32>
    %cst_7 = arith.constant dense<0.000000e+00> : vector<128xf32>
    %16 = vector.multi_reduction <add>, %15, %cst_7 [0] : vector<8x128xf32> to vector<128xf32>
    %17 = vector.shape_cast %16 : vector<128xf32> to vector<1x128xf32>
    %c0_8 = arith.constant 0 : index
    %c0_9 = arith.constant 0 : index
    %c0_10 = arith.constant 0 : index
    %18 = vector.load %arg5[%c0_8, %c0_9, %c0_10] : memref<1x1x128xf32, #tpu.memory_space<vmem>>, vector<1x1x128xf32>
    %19 = arith.mulf %17, %5 : vector<1x128xf32>
    %20 = vector.shape_cast %19 : vector<1x128xf32> to vector<1x1x128xf32>
    %21 = arith.addf %18, %20 : vector<1x1x128xf32>
    %c0_11 = arith.constant 0 : index
    %c0_12 = arith.constant 0 : index
    %c0_13 = arith.constant 0 : index
    %22 = vector.load %arg5[%c0_11, %c0_12, %c0_13] : memref<1x1x128xf32, #tpu.memory_space<vmem>>, vector<1x1x128xf32>
    tpu.vector_store %arg5[%c0_11, %c0_12, %c0_13], %21 {strides = array<i32>} : memref<1x1x128xf32, #tpu.memory_space<vmem>>, vector<1x1x128xf32>,
    return
  }
  func.func @transform_0(%arg0: i32, %arg1: i32) -> (i32, i32) {
    %c1_i32 = arith.constant 1 : i32
    %0 = arith.muli %arg0, %c1_i32 : i32
    %1 = arith.addi %0, %arg1 : i32
    %c0_i32 = arith.constant 0 : i32
    %c0_i32_0 = arith.constant 0 : i32
    return %1, %c0_i32 : i32, i32
  }
  func.func @transform_1(%arg0: i32, %arg1: i32) -> (i32, i32) {
    %c1_i32 = arith.constant 1 : i32
    %0 = arith.muli %arg0, %c1_i32 : i32
    %1 = arith.addi %0, %arg1 : i32
    %c0_i32 = arith.constant 0 : i32
    %c0_i32_0 = arith.constant 0 : i32
    return %1, %c0_i32 : i32, i32
  }
  func.func @transform_2(%arg0: i32, %arg1: i32) -> (i32, i32) {
    %c0_i32 = arith.constant 0 : i32
    %c0_i32_0 = arith.constant 0 : i32
    %c0_i32_1 = arith.constant 0 : i32
    return %c0_i32, %c0_i32_0 : i32, i32
  }
  func.func @transform_3(%arg0: i32, %arg1: i32) -> (i32, i32, i32) {
    %c0_i32 = arith.constant 0 : i32
    %c0_i32_0 = arith.constant 0 : i32
    %c0_i32_1 = arith.constant 0 : i32
    return %arg0, %c0_i32, %c0_i32_0 : i32, i32, i32
  }
}

</mosaic_0001>

<bundles_post_ra>
// kernel: tpu_custom_call.1
= control target key start
LH: loop header
LB: loop body
LE: loop exit
PB: predicated region body
PF: predicated region fallthrough
CT: control target
= control target key end

     0   :  { %8 = vsyncpa [#allocation3], 0  ;;  %s241_s0 = inlined_call_operand.hbm [shape: f32[8,128], index: 0, kind: input, shape index: {}]   ;;  %s242_s1 = inlined_call_operand.hbm [shape: f32[8,128], index: 1, kind: input, shape index: {}]   ;;  %s243_s2 = inlined_call_operand.vmem [shape: f32[1,128], index: 2, kind: input, shape index: {}]   ;;  %s244_s3 = inlined_call_operand.hbm [shape: f32[1,1,128], index: 3, kind: output, shape index: {}]  }
   0x1   :  { %9 = vsyncpa [#allocation6], 0 }
   0x2   :  { %10 = vsyncpa [#allocation4], 0  ;;  %s178_s12 = smov [#allocation2]   ;;  %s179_s14 = smov [#allocation5]  }
   0x3   :  { %s20_s13 = sshll.u32 %s178_s12, 4  ;;  %s33_s15 = sshll.u32 %s179_s14, 4  ;;  %s21_s13 = int_to_ptr.vmem [resolvable:$true] %s20_s13  ;;  %s34_s15 = int_to_ptr.vmem [resolvable:$true] %s33_s15 }
   0x4   :  { %s106_s18 = scalar_lea.hbm %s241_s0, 128 }
   0x5   :  { %p107_p0 = scmp.ne.s32.totalorder %s241_s0, %s106_s18  ;;  %p110_p1 = scmp.lt.u32.totalorder %s106_s18, %s241_s0 }
   0x7   :  { %p112_p2 = pnand %p110_p1, %p107_p0 }
   0x9   :  { %115 = shalt.err (!%p112_p2)
}
   0xa   :  { %s116_s23 = scalar_lea.vmem %s21_s13, 128  ;;  %p121_p4 = scmp.lt.s32.totalorder %s21_s13, %s21_s13 }
   0xb   :  { %p117_p3 = scmp.ne.s32.totalorder %s21_s13, %s116_s23  ;;  %p122_p5 = scmp.lt.s32.totalorder %s116_s23, %s116_s23 }
   0xd   :  { %p123_p6 = por %p122_p5, %p121_p4 }
   0xf   :  { %p124_p7 = pnand %p123_p6, %p117_p3 }
  0x11   :  { %127 = shalt.err (!%p124_p7)
}
  0x12   :  { %23 = dma.hbm_to_vmem [thread:$0]  %s241_s0, 128, %s21_s13, [#allocation3]  }
  0x13   :  { %s128_s28 = scalar_lea.hbm %s242_s1, 128 }
  0x14   :  { %p129_p8 = scmp.ne.s32.totalorder %s242_s1, %s128_s28  ;;  %p132_p9 = scmp.lt.u32.totalorder %s128_s28, %s242_s1 }
  0x16   :  { %p134_p10 = pnand %p132_p9, %p129_p8 }
  0x18   :  { %137 = shalt.err (!%p134_p10)
}
  0x19   :  { %s138_s6 = scalar_lea.vmem %s34_s15, 128  ;;  %p143_p12 = scmp.lt.s32.totalorder %s34_s15, %s34_s15 }
  0x1a   :  { %p139_p11 = scmp.ne.s32.totalorder %s34_s15, %s138_s6  ;;  %p144_p13 = scmp.lt.s32.totalorder %s138_s6, %s138_s6 }
  0x1c   :  { %p145_p0 = por %p144_p13, %p143_p12 }
  0x1e   :  { %p146_p1 = pnand %p145_p0, %p139_p11 }
  0x20   :  { %149 = shalt.err (!%p146_p1)
}
  0x21   :  { %36 = dma.hbm_to_vmem [thread:$0]  %s242_s1, 128, %s34_s15, [#allocation6]  }
  0x22   :  { %172 = dma.done.wait [#allocation3], 128  }
  0x23   :  { %173 = vsyncadd [#allocation3], 4294967168 }
  0x24   :  { %174 = dma.done.wait [#allocation6], 128  }
  0x25   :  { %175 = vsyncadd [#allocation6], 4294967168  ;;  %v180_v0 = vmov 0.0   ;;  %v52_v1 = vld [vmem:[#allocation2] sm:$0xff]  ;;  %v53_v8 = vld [vmem:[#allocation5] sm:$0xff]  ;;  %s181_s9 = smov [#allocation7]  }
  0x26   :  { %51 = vst [vmem:[#allocation7] sm:$0x1] %v180_v0  ;;  %v58_v2 = vand.u32 2147483647, %v52_v1  ;;  %v55_v10 = vmax.f32 %v52_v1, 0.0  ;;  %v56_v11 = vmul.f32 %v53_v8, %v52_v1  ;;  %s88_s10 = sshll.u32 %s181_s9, 4  ;;  %s89_s10 = int_to_ptr.vmem [resolvable:$true] %s88_s10 }
  0x27   :  { %v54_v24 = vld [vmem:[%s243_s2] sm:$0x1]  ;;  %s150_s11 = scalar_lea.vmem %s89_s10, 16  ;;  %s154_s12 = scalar_lea.vmem %s89_s10, 32 }
  0x28   :  { %v59_v3 = vsub.f32 0.0, %v58_v2  ;;  %v57_v15 = vsub.f32 %v55_v10, %v56_v11  ;;  %p151_p2 = scmp.ne.s32.totalorder %s89_s10, %s150_s11  ;;  %p155_p3 = scmp.lt.s32.totalorder %s89_s10, %s89_s10 }
  0x29   :  { %p156_p4 = scmp.lt.s32.totalorder %s154_s12, %s150_s11 }
  0x2a   :  { %v60_v4 = vmul.f32 1.442695, %v59_v3 }
  0x2b   :  { %p157_p5 = por %p156_p4, %p155_p3 }
  0x2c   :  { %102 = vpow2.f32 %v60_v4 }
  0x2d   :  { %v78_v26 = vld [vmem:[#allocation7] sm:$0x1]  ;;  %p158_p6 = pnand %p157_p5, %p151_p2 }
  0x36   :  { %v103_v5 = vpop.eup %102 }
  0x37   :  { %v62_v6 = vadd.f32 1.0, %v103_v5  ;;  %v65_v7 = vmul.f32 -0.5, %v103_v5  ;;  %v68_v12 = vand.u32 2147483647, %v103_v5 }
  0x39   :  { %104 = vlog2.f32 %v62_v6  ;;  %v66_v9 = vadd.f32 1.0, %v65_v7  ;;  %vm69_vm0 = vcmp.lt.f32.partialorder %v68_v12, 0.0004427343 }
  0x3b   :  { %v67_v13 = vmul.f32 %v103_v5, %v66_v9 }
  0x43   :  { %v105_v14 = vpop.eup %104 }
  0x44   :  { %v64_v16 = vmul.f32 0.6931472, %v105_v14 }
  0x46   :  { %v70_v17 = vsel %vm69_vm0, %v67_v13, %v64_v16 }
  0x47   :  { %v71_v18 = vadd.f32 %v70_v17, %v57_v15 }
  0x49   :  { %v72_v19 = vrot.slane %v71_v18, 4 }
  0x4b   :  { %v73_v20 = vadd.f32 %v72_v19, %v71_v18 }
  0x4d   :  { %v74_v21 = vrot.slane %v73_v20, 2 }
  0x4f   :  { %v75_v22 = vadd.f32 %v74_v21, %v73_v20 }
  0x51   :  { %v76_v23 = vrot.slane %v75_v22, 1 }
  0x53   :  { %v77_v25 = vadd.f32 %v76_v23, %v75_v22 }
  0x55   :  { %v79_v27 = vmul.f32 %v77_v25, %v54_v24 }
  0x57   :  { %v80_v28 = vadd.f32 %v79_v27, %v78_v26 }
  0x59   :  { %81 = vst [vmem:[#allocation7] sm:$0x1] %v80_v28 }
  0x5a   :  { %161 = shalt.err (!%p158_p6)
}
  0x5b   :  { %s162_s2 = scalar_lea.hbm %s244_s3, 16 }
  0x5c   :  { %p163_p7 = scmp.ne.s32.totalorder %s244_s3, %s162_s2  ;;  %p166_p8 = scmp.lt.u32.totalorder %s162_s2, %s244_s3 }
  0x5e   :  { %p168_p9 = pnand %p166_p8, %p163_p7 }
  0x60   :  { %171 = shalt.err (!%p168_p9)
}
  0x61   :  { %91 = dma.vmem_to_hbm [thread:$0]  %s89_s10, 16, %s244_s3, [#allocation4]  }
  0x62   :  { %176 = dma.done.wait [#allocation4], 16  }
  0x63   :  { %177 = vsyncadd [#allocation4], 4294967280 }
  0x64   :  { %95 = vsyncpa [#allocation3], 1 }
  0x65   :  { %96 = vsyncpa [#allocation6], 1 }
  0x66   :  { %97 = vsyncpa [#allocation4], 1 }

</bundles_post_ra>
